<compile_context>
chip_gen: v5e
topology: v5e:2x2
jax: 0.10.0
libtpu: 0.0.40
codegen_flags: <defaults>
</compile_context>

<pallas_src>
import jax
import jax.numpy as jnp
from jax import lax
from jax.experimental import pallas as pl
from jax.experimental.pallas import tpu as pltpu


N_OUT = 10
N_OUT_PAD = 128          # lane-dense padded logits width


# ----------------------------------------------------------------------------
# Fused kernel: conv1+pool -> conv2+pool -> fc1 -> fc2, all VMEM-resident.
# ----------------------------------------------------------------------------
def _cnn_fused_kernel(x_ref, w1_ref, b1_ref, w2_ref, b2_ref,
                      wf1_ref, bf1_ref, wf2_ref, bf2_ref, o_ref):
    def sigmoid(v):
        # One EUP tanh + one FMA (cheaper than exp + exact reciprocal).
        return 0.5 * jnp.tanh(0.5 * v) + 0.5

    def pool_max4(v, w):
        # v: (bm, 4*w); the 4 lane-dense 128-wide chunks are the 4 positions of
        # every 2x2 pool window -> elementwise max over chunks == 2x2 max-pool.
        return jnp.maximum(jnp.maximum(v[:, 0:w], v[:, w:2 * w]),
                           jnp.maximum(v[:, 2 * w:3 * w], v[:, 3 * w:4 * w]))

    x = x_ref[...]                                                 # bf16 (bm, 256)
    # conv1 + bias + sigmoid + 2x2 max-pool  (one MXU matmul, f32 accumulate).
    s1 = sigmoid(jnp.dot(x, w1_ref[...],
                         preferred_element_type=jnp.float32) + b1_ref[...])
    h1 = pool_max4(s1, 128)                   # (bm, 128) = NCHW-flat (2, 8, 8)
    # conv2 + bias + sigmoid + pool (output channels zero-padded 4 -> 8 so
    # every chunk is a full 128 lanes).
    s2 = sigmoid(jnp.dot(h1.astype(jnp.bfloat16), w2_ref[...],
                         preferred_element_type=jnp.float32) + b2_ref[...])
    h2 = pool_max4(s2, 128)                   # (bm, 128): [0:64] real, [64:] pad
    # fc1 + sigmoid (padded to 128 lanes; pad columns have zero weight/bias).
    h3 = sigmoid(jnp.dot(h2.astype(jnp.bfloat16), wf1_ref[...],
                         preferred_element_type=jnp.float32) + bf1_ref[...])
    # fc2, padded to 128 lanes -> lane-dense unmasked store.
    o_ref[...] = jnp.dot(h3.astype(jnp.bfloat16), wf2_ref[...],
                         preferred_element_type=jnp.float32) + bf2_ref[...]


def _full_spec(a):
    # Whole-array block, same block index at every grid step (no re-DMA).
    return pl.BlockSpec(a.shape, lambda i: (0,) * a.ndim)


def _plan_batch(batch):
    """Return (bm, padded_batch): fixed tile + cdiv grid, >=2 steps when possible."""
    if batch <= 128:
        return batch, batch                     # single block == full array
    # Cap at 1024 (bounded VMEM per tile), and at ~batch/2 so v7x's two
    # TensorCores both get grid iterations to shard over.
    bm = min(1024, max(128, ((batch // 2) // 128) * 128))
    return bm, pl.cdiv(batch, bm) * bm


@jax.jit
def cnn_forward(x_nchw, kparams):
    """x_nchw: (B, 1, 16, 16) float32. kparams: output of prepare_params."""
    W1, B1, W2, B2, Wf1, Bf1, Wf2, Bf2 = kparams
    batch = x_nchw.shape[0]
    # bf16 stream: x is the only real HBM input traffic (0.5 KB/sample).
    x2d = x_nchw.reshape(batch, -1).astype(jnp.bfloat16)
    bm, padded = _plan_batch(batch)
    if padded != batch:
        x2d = jnp.pad(x2d, ((0, padded - batch), (0, 0)))

    out = pl.pallas_call(
        _cnn_fused_kernel,
        out_shape=jax.ShapeDtypeStruct((padded, N_OUT_PAD), jnp.float32),
        grid=(padded // bm,),
        in_specs=[pl.BlockSpec((bm, x2d.shape[1]), lambda i: (i, 0))]
                 + [_full_spec(a) for a in (W1, B1, W2, B2, Wf1, Bf1, Wf2, Bf2)],
        out_specs=pl.BlockSpec((bm, N_OUT_PAD), lambda i: (i, 0)),
        compiler_params=pltpu.CompilerParams(
            dimension_semantics=("parallel",)),
    )(x2d, W1, B1, W2, B2, Wf1, Bf1, Wf2, Bf2)
    return out[:batch, :N_OUT]


# ----------------------------------------------------------------------------
# One-time parameter preparation (kept OUT of the jitted forward).
# Builds, per conv layer, a dense matrix whose 4 column chunks are the 4 pool
# phases of the convolution, by pushing the identity basis through lax.conv.
# ----------------------------------------------------------------------------
def prepare_params(params):
    w1, b1, w2, b2, wf1, bf1, wf2, bf2 = params

    def conv_pool_matrix(w, b, cin, hw, cout_pad):
        cout = w.shape[0]
        if cout_pad > cout:                     # zero-pad output channels
            w = jnp.concatenate(
                [w, jnp.zeros((cout_pad - cout,) + w.shape[1:], w.dtype)], axis=0)
            b = jnp.concatenate([b, jnp.zeros((cout_pad - cout,), b.dtype)])
        n_in = cin * hw * hw
        ho = hw // 2
        basis = jnp.eye(n_in, dtype=jnp.float32).reshape(n_in, cin, hw, hw)
        resp = lax.conv_general_dilated(
            basis, w, window_strides=(1, 1), padding=((1, 1), (1, 1)),
            dimension_numbers=("NCHW", "OIHW", "NCHW"),
            precision=lax.Precision.HIGHEST)    # (n_in, cout_pad, hw, hw)
        chunks = [resp[:, :, py::2, px::2].reshape(n_in, cout_pad * ho * ho)
                  for py in range(2) for px in range(2)]
        W = jnp.concatenate(chunks, axis=1)     # (n_in, 4*cout_pad*ho*ho)
        bias = jnp.tile(jnp.repeat(b, ho * ho), 4).reshape(1, -1)
        return W.astype(jnp.bfloat16), bias.astype(jnp.float32)

    W1, B1 = conv_pool_matrix(w1, b1, cin=1, hw=16, cout_pad=2)   # (256, 512)
    W2, B2 = conv_pool_matrix(w2, b2, cin=2, hw=8,  cout_pad=8)   # (128, 512)

    # fc1: (40, 64) -> (128, 128).  Rows 64..127 are zero (conv2 channel pad
    # contributes nothing); columns 40..127 are zero (lane padding).
    k1, n1 = wf1.shape[1], wf1.shape[0]
    Wf1 = jnp.zeros((128, 128), jnp.float32).at[:k1, :n1].set(wf1.T)
    Bf1 = jnp.zeros((1, 128), jnp.float32).at[0, :n1].set(bf1)
    # fc2: (10, 40) -> (128, 128).  Rows 40..127 zero so the padded sigmoid(0)
    # lanes of h3 contribute nothing; columns 10..127 zero.
    k2, n2 = wf2.shape[1], wf2.shape[0]
    Wf2 = jnp.zeros((128, 128), jnp.float32).at[:k2, :n2].set(wf2.T)
    Bf2 = jnp.zeros((1, 128), jnp.float32).at[0, :n2].set(bf2)

    return (W1, B1, W2, B2,
            Wf1.astype(jnp.bfloat16), Bf1,
            Wf2.astype(jnp.bfloat16), Bf2)


# ----------------------------------------------------------------------------
# Pure-JAX f32 reference matching the PyTorch module semantics.
# ----------------------------------------------------------------------------
def _reference_forward(x_nchw, params):
    w1, b1, w2, b2, wf1, bf1, wf2, bf2 = params

    def conv(x, w, b):
        y = lax.conv_general_dilated(
            x, w, window_strides=(1, 1), padding=((1, 1), (1, 1)),
            dimension_numbers=("NCHW", "OIHW", "NCHW"),
            precision=lax.Precision.HIGHEST)
        return y + b[None, :, None, None]

    def pool(x):
        return lax.reduce_window(x, -jnp.inf, lax.max,
                                 (1, 1, 2, 2), (1, 1, 2, 2), "VALID")

    def sig(v):
        return 1.0 / (1.0 + jnp.exp(-v))

    h = pool(sig(conv(x_nchw, w1, b1)))
    h = pool(sig(conv(h, w2, b2)))
    h = h.reshape(h.shape[0], -1)
    h = sig(h @ wf1.T + bf1)
    return h @ wf2.T + bf2


def init_params(key):
    ks = jax.random.split(key, 8)

    def u(k, shape, fan_in):
        bound = 1.0 / float(fan_in) ** 0.5
        return jax.random.uniform(k, shape, jnp.float32, -bound, bound)

    w1 = u(ks[0], (2, 1, 3, 3), 1 * 9)     # conv1: Conv2d(1, 2, 3, padding=1)
    b1 = u(ks[1], (2,), 1 * 9)
    w2 = u(ks[2], (4, 2, 3, 3), 2 * 9)     # conv2: Conv2d(2, 4, 3, padding=1)
    b2 = u(ks[3], (4,), 2 * 9)
    wf1 = u(ks[4], (40, 64), 64)           # fc1: Linear(64, 40)
    bf1 = u(ks[5], (40,), 64)
    wf2 = u(ks[6], (10, 40), 40)           # fc2: Linear(40, 10)
    bf2 = u(ks[7], (10,), 40)
    return (w1, b1, w2, b2, wf1, bf1, wf2, bf2)


if __name__ == "__main__":
    key = jax.random.PRNGKey(0)
    k_par, k_x, k_x2 = jax.random.split(key, 3)
    params = init_params(k_par)
    kparams = prepare_params(params)       # one-time, outside the jitted path

    # 16x16 single-channel input so two 2x2 pools give the 4*4*4 flatten.
    x = jax.random.normal(k_x, (2, 1, 16, 16), jnp.float32)   # NCHW

    out = jax.block_until_ready(cnn_forward(x, kparams))
    assert out.shape == (2, 10) and out.dtype == jnp.float32

    ref = jax.block_until_ready(_reference_forward(x, params))
    # bf16 MXU operands with f32 accumulation: quantization error is ~1e-3 on
    # the logits, so a 1e-2 tolerance against the f32 reference is safe.
    assert jnp.allclose(out, ref, rtol=1e-2, atol=1e-2), (out, ref)

    # Exercise the gridded / batch-padded path (bm=128, grid=3, 84 pad rows).
    xb = jax.random.normal(k_x2, (300, 1, 16, 16), jnp.float32)
    outb = jax.block_until_ready(cnn_forward(xb, kparams))
    refb = jax.block_until_ready(_reference_forward(xb, params))
    assert outb.shape == (300, 10)
    assert jnp.allclose(outb, refb, rtol=1e-2, atol=1e-2)

    print("KERNEL_OK")
</pallas_src>

<mosaic_0001>
module attributes {stable_mosaic.version = 11 : i64} {
  func.func @_cnn_fused_kernel(%arg0: i32, %arg1: memref<2x256xbf16, #tpu.memory_space<vmem>>, %arg2: memref<256x512xbf16, #tpu.memory_space<vmem>>, %arg3: memref<1x512xf32, #tpu.memory_space<vmem>>, %arg4: memref<128x512xbf16, #tpu.memory_space<vmem>>, %arg5: memref<1x512xf32, #tpu.memory_space<vmem>>, %arg6: memref<128x128xbf16, #tpu.memory_space<vmem>>, %arg7: memref<1x128xf32, #tpu.memory_space<vmem>>, %arg8: memref<128x128xbf16, #tpu.memory_space<vmem>>, %arg9: memref<1x128xf32, #tpu.memory_space<vmem>>, %arg10: memref<2x128xf32, #tpu.memory_space<vmem>>) attributes {dimension_semantics = [#tpu.dimension_semantics<parallel>], iteration_bounds = array<i64: 1>, scalar_prefetch = 0 : i64, scratch_operands = 0 : i64, tpu.core_type = #tpu.core_type<tc>, window_params = [{transform_indices = @transform_0, window_bounds = array<i64: 2, 256>}, {pipeline_mode = #tpu.pipeline_mode<synchronous>, transform_indices = @transform_1, window_bounds = array<i64: 256, 512>}, {pipeline_mode = #tpu.pipeline_mode<synchronous>, transform_indices = @transform_2, window_bounds = array<i64: 1, 512>}, {pipeline_mode = #tpu.pipeline_mode<synchronous>, transform_indices = @transform_3, window_bounds = array<i64: 128, 512>}, {pipeline_mode = #tpu.pipeline_mode<synchronous>, transform_indices = @transform_4, window_bounds = array<i64: 1, 512>}, {pipeline_mode = #tpu.pipeline_mode<synchronous>, transform_indices = @transform_5, window_bounds = array<i64: 128, 128>}, {pipeline_mode = #tpu.pipeline_mode<synchronous>, transform_indices = @transform_6, window_bounds = array<i64: 1, 128>}, {pipeline_mode = #tpu.pipeline_mode<synchronous>, transform_indices = @transform_7, window_bounds = array<i64: 128, 128>}, {pipeline_mode = #tpu.pipeline_mode<synchronous>, transform_indices = @transform_8, window_bounds = array<i64: 1, 128>}, {transform_indices = @transform_9, window_bounds = array<i64: 2, 128>}]} {
    %c0 = arith.constant 0 : index
    %c0_0 = arith.constant 0 : index
    %0 = vector.load %arg1[%c0, %c0_0] : memref<2x256xbf16, #tpu.memory_space<vmem>>, vector<2x256xbf16>
    %c0_1 = arith.constant 0 : index
    %c0_2 = arith.constant 0 : index
    %1 = vector.load %arg2[%c0_1, %c0_2] : memref<256x512xbf16, #tpu.memory_space<vmem>>, vector<256x512xbf16>
    %cst = arith.constant dense<0.000000e+00> : vector<2x512xf32>
    %2 = tpu.matmul %0, %1, %cst {dimension_numbers = #tpu.dot_dimension_numbers<[1], [0], [0], [1], [0, 0, 1, 1], [], []>} : vector<2x256xbf16>, vector<256x512xbf16>, vector<2x512xf32> -> vector<2x512xf32>
    %c0_3 = arith.constant 0 : index
    %c0_4 = arith.constant 0 : index
    %3 = vector.load %arg3[%c0_3, %c0_4] : memref<1x512xf32, #tpu.memory_space<vmem>>, vector<1x512xf32>
    %4 = vector.broadcast %3 : vector<1x512xf32> to vector<2x512xf32>
    %5 = arith.addf %2, %4 : vector<2x512xf32>
    %cst_5 = arith.constant 5.000000e-01 : f32
    %6 = vector.broadcast %cst_5 : f32 to vector<2x512xf32>
    %7 = arith.mulf %6, %5 : vector<2x512xf32>
    %8 = math.tanh %7 : vector<2x512xf32>
    %cst_6 = arith.constant 5.000000e-01 : f32
    %9 = vector.broadcast %cst_6 : f32 to vector<2x512xf32>
    %10 = arith.mulf %9, %8 : vector<2x512xf32>
    %cst_7 = arith.constant 5.000000e-01 : f32
    %11 = vector.broadcast %cst_7 : f32 to vector<2x512xf32>
    %12 = arith.addf %10, %11 : vector<2x512xf32>
    %13 = vector.extract_strided_slice %12 {offsets = [0, 0], sizes = [2, 128], strides = [1, 1]} : vector<2x512xf32> to vector<2x128xf32>
    %14 = vector.extract_strided_slice %12 {offsets = [0, 128], sizes = [2, 128], strides = [1, 1]} : vector<2x512xf32> to vector<2x128xf32>
    %15 = arith.maximumf %13, %14 : vector<2x128xf32>
    %16 = vector.extract_strided_slice %12 {offsets = [0, 256], sizes = [2, 128], strides = [1, 1]} : vector<2x512xf32> to vector<2x128xf32>
    %17 = vector.extract_strided_slice %12 {offsets = [0, 384], sizes = [2, 128], strides = [1, 1]} : vector<2x512xf32> to vector<2x128xf32>
    %18 = arith.maximumf %16, %17 : vector<2x128xf32>
    %19 = arith.maximumf %15, %18 : vector<2x128xf32>
    %20 = arith.truncf %19 : vector<2x128xf32> to vector<2x128xbf16>
    %c0_8 = arith.constant 0 : index
    %c0_9 = arith.constant 0 : index
    %21 = vector.load %arg4[%c0_8, %c0_9] : memref<128x512xbf16, #tpu.memory_space<vmem>>, vector<128x512xbf16>
    %cst_10 = arith.constant dense<0.000000e+00> : vector<2x512xf32>
    %22 = tpu.matmul %20, %21, %cst_10 {dimension_numbers = #tpu.dot_dimension_numbers<[1], [0], [0], [1], [0, 0, 1, 1], [], []>} : vector<2x128xbf16>, vector<128x512xbf16>, vector<2x512xf32> -> vector<2x512xf32>
    %c0_11 = arith.constant 0 : index
    %c0_12 = arith.constant 0 : index
    %23 = vector.load %arg5[%c0_11, %c0_12] : memref<1x512xf32, #tpu.memory_space<vmem>>, vector<1x512xf32>
    %24 = vector.broadcast %23 : vector<1x512xf32> to vector<2x512xf32>
    %25 = arith.addf %22, %24 : vector<2x512xf32>
    %cst_13 = arith.constant 5.000000e-01 : f32
    %26 = vector.broadcast %cst_13 : f32 to vector<2x512xf32>
    %27 = arith.mulf %26, %25 : vector<2x512xf32>
    %28 = math.tanh %27 : vector<2x512xf32>
    %cst_14 = arith.constant 5.000000e-01 : f32
    %29 = vector.broadcast %cst_14 : f32 to vector<2x512xf32>
    %30 = arith.mulf %29, %28 : vector<2x512xf32>
    %cst_15 = arith.constant 5.000000e-01 : f32
    %31 = vector.broadcast %cst_15 : f32 to vector<2x512xf32>
    %32 = arith.addf %30, %31 : vector<2x512xf32>
    %33 = vector.extract_strided_slice %32 {offsets = [0, 0], sizes = [2, 128], strides = [1, 1]} : vector<2x512xf32> to vector<2x128xf32>
    %34 = vector.extract_strided_slice %32 {offsets = [0, 128], sizes = [2, 128], strides = [1, 1]} : vector<2x512xf32> to vector<2x128xf32>
    %35 = arith.maximumf %33, %34 : vector<2x128xf32>
    %36 = vector.extract_strided_slice %32 {offsets = [0, 256], sizes = [2, 128], strides = [1, 1]} : vector<2x512xf32> to vector<2x128xf32>
    %37 = vector.extract_strided_slice %32 {offsets = [0, 384], sizes = [2, 128], strides = [1, 1]} : vector<2x512xf32> to vector<2x128xf32>
    %38 = arith.maximumf %36, %37 : vector<2x128xf32>
    %39 = arith.maximumf %35, %38 : vector<2x128xf32>
    %40 = arith.truncf %39 : vector<2x128xf32> to vector<2x128xbf16>
    %c0_16 = arith.constant 0 : index
    %c0_17 = arith.constant 0 : index
    %41 = vector.load %arg6[%c0_16, %c0_17] : memref<128x128xbf16, #tpu.memory_space<vmem>>, vector<128x128xbf16>
    %cst_18 = arith.constant dense<0.000000e+00> : vector<2x128xf32>
    %42 = tpu.matmul %40, %41, %cst_18 {dimension_numbers = #tpu.dot_dimension_numbers<[1], [0], [0], [1], [0, 0, 1, 1], [], []>} : vector<2x128xbf16>, vector<128x128xbf16>, vector<2x128xf32> -> vector<2x128xf32>
    %c0_19 = arith.constant 0 : index
    %c0_20 = arith.constant 0 : index
    %43 = vector.load %arg7[%c0_19, %c0_20] : memref<1x128xf32, #tpu.memory_space<vmem>>, vector<1x128xf32>
    %44 = vector.broadcast %43 : vector<1x128xf32> to vector<2x128xf32>
    %45 = arith.addf %42, %44 : vector<2x128xf32>
    %cst_21 = arith.constant 5.000000e-01 : f32
    %46 = vector.broadcast %cst_21 : f32 to vector<2x128xf32>
    %47 = arith.mulf %46, %45 : vector<2x128xf32>
    %48 = math.tanh %47 : vector<2x128xf32>
    %cst_22 = arith.constant 5.000000e-01 : f32
    %49 = vector.broadcast %cst_22 : f32 to vector<2x128xf32>
    %50 = arith.mulf %49, %48 : vector<2x128xf32>
    %cst_23 = arith.constant 5.000000e-01 : f32
    %51 = vector.broadcast %cst_23 : f32 to vector<2x128xf32>
    %52 = arith.addf %50, %51 : vector<2x128xf32>
    %53 = arith.truncf %52 : vector<2x128xf32> to vector<2x128xbf16>
    %c0_24 = arith.constant 0 : index
    %c0_25 = arith.constant 0 : index
    %54 = vector.load %arg8[%c0_24, %c0_25] : memref<128x128xbf16, #tpu.memory_space<vmem>>, vector<128x128xbf16>
    %cst_26 = arith.constant dense<0.000000e+00> : vector<2x128xf32>
    %55 = tpu.matmul %53, %54, %cst_26 {dimension_numbers = #tpu.dot_dimension_numbers<[1], [0], [0], [1], [0, 0, 1, 1], [], []>} : vector<2x128xbf16>, vector<128x128xbf16>, vector<2x128xf32> -> vector<2x128xf32>
    %c0_27 = arith.constant 0 : index
    %c0_28 = arith.constant 0 : index
    %56 = vector.load %arg9[%c0_27, %c0_28] : memref<1x128xf32, #tpu.memory_space<vmem>>, vector<1x128xf32>
    %57 = vector.broadcast %56 : vector<1x128xf32> to vector<2x128xf32>
    %58 = arith.addf %55, %57 : vector<2x128xf32>
    %c0_29 = arith.constant 0 : index
    %c0_30 = arith.constant 0 : index
    %59 = vector.load %arg10[%c0_29, %c0_30] : memref<2x128xf32, #tpu.memory_space<vmem>>, vector<2x128xf32>
    tpu.vector_store %arg10[%c0_29, %c0_30], %58 {strides = array<i32>} : memref<2x128xf32, #tpu.memory_space<vmem>>, vector<2x128xf32>,
    return
  }
  func.func @transform_0(%arg0: i32) -> (i32, i32) {
    %c0_i32 = arith.constant 0 : i32
    %c0_i32_0 = arith.constant 0 : i32
    return %arg0, %c0_i32 : i32, i32
  }
  func.func @transform_1(%arg0: i32) -> (i32, i32) {
    %c0_i32 = arith.constant 0 : i32
    %c0_i32_0 = arith.constant 0 : i32
    %c0_i32_1 = arith.constant 0 : i32
    return %c0_i32, %c0_i32_0 : i32, i32
  }
  func.func @transform_2(%arg0: i32) -> (i32, i32) {
    %c0_i32 = arith.constant 0 : i32
    %c0_i32_0 = arith.constant 0 : i32
    %c0_i32_1 = arith.constant 0 : i32
    return %c0_i32, %c0_i32_0 : i32, i32
  }
  func.func @transform_3(%arg0: i32) -> (i32, i32) {
    %c0_i32 = arith.constant 0 : i32
    %c0_i32_0 = arith.constant 0 : i32
    %c0_i32_1 = arith.constant 0 : i32
    return %c0_i32, %c0_i32_0 : i32, i32
  }
  func.func @transform_4(%arg0: i32) -> (i32, i32) {
    %c0_i32 = arith.constant 0 : i32
    %c0_i32_0 = arith.constant 0 : i32
    %c0_i32_1 = arith.constant 0 : i32
    return %c0_i32, %c0_i32_0 : i32, i32
  }
  func.func @transform_5(%arg0: i32) -> (i32, i32) {
    %c0_i32 = arith.constant 0 : i32
    %c0_i32_0 = arith.constant 0 : i32
    %c0_i32_1 = arith.constant 0 : i32
    return %c0_i32, %c0_i32_0 : i32, i32
  }
  func.func @transform_6(%arg0: i32) -> (i32, i32) {
    %c0_i32 = arith.constant 0 : i32
    %c0_i32_0 = arith.constant 0 : i32
    %c0_i32_1 = arith.constant 0 : i32
    return %c0_i32, %c0_i32_0 : i32, i32
  }
  func.func @transform_7(%arg0: i32) -> (i32, i32) {
    %c0_i32 = arith.constant 0 : i32
    %c0_i32_0 = arith.constant 0 : i32
    %c0_i32_1 = arith.constant 0 : i32
    return %c0_i32, %c0_i32_0 : i32, i32
  }
  func.func @transform_8(%arg0: i32) -> (i32, i32) {
    %c0_i32 = arith.constant 0 : i32
    %c0_i32_0 = arith.constant 0 : i32
    %c0_i32_1 = arith.constant 0 : i32
    return %c0_i32, %c0_i32_0 : i32, i32
  }
  func.func @transform_9(%arg0: i32) -> (i32, i32) {
    %c0_i32 = arith.constant 0 : i32
    %c0_i32_0 = arith.constant 0 : i32
    return %arg0, %c0_i32 : i32, i32
  }
}

</mosaic_0001>

<bundles_post_ra>
// kernel: cnn_forward.1
= control target key start
LH: loop header
LB: loop body
LE: loop exit
PB: predicated region body
PF: predicated region fallthrough
CT: control target
= control target key end

     0   :  { %14 = vsyncpa [#allocation3], 0  ;;  %s1937_s0 = inlined_call_operand.vmem [shape: bf16[2,256], index: 0, kind: input, shape index: {}]   ;;  %s1938_s1 = inlined_call_operand.hbm [shape: bf16[256,512], index: 1, kind: input, shape index: {}]   ;;  %s1939_s2 = inlined_call_operand.vmem [shape: f32[1,512], index: 2, kind: input, shape index: {}]   ;;  %s1940_s3 = inlined_call_operand.hbm [shape: bf16[128,512], index: 3, kind: input, shape index: {}]   ;;  %s1941_s4 = inlined_call_operand.hbm [shape: f32[1,512], index: 4, kind: input, shape index: {}]   ;;  %s1942_s5 = inlined_call_operand.vmem [shape: bf16[128,128], index: 5, kind: input, shape index: {}]   ;;  %s1943_s6 = inlined_call_operand.vmem [shape: f32[1,128], index: 6, kind: input, shape index: {}]   ;;  %s1944_s7 = inlined_call_operand.hbm [shape: bf16[128,128], index: 7, kind: input, shape index: {}]   ;;  %s1945_s8 = inlined_call_operand.vmem [shape: f32[1,128], index: 8, kind: input, shape index: {}]   ;;  %s1946_s9 = inlined_call_operand.hbm [shape: f32[2,128], index: 9, kind: output, shape index: {}]  }
   0x1   :  { %15 = vsyncpa [#allocation6], 0 }
   0x2   :  { %16 = vsyncpa [#allocation9], 0 }
   0x3   :  { %17 = vsyncpa [#allocation4], 0  ;;  %s39_s11 = sshll.u32 %s1940_s3, 4  ;;  %s1797_s12 = smov [#allocation5]   ;;  %s40_s11 = int_to_ptr.hbm [resolvable:$true] %s39_s11 }
   0x4   :  { %s41_s13 = sshll.u32 %s1797_s12, 4  ;;  %s24_s16 = sshll.u32 %s1938_s1, 4  ;;  %s42_s13 = int_to_ptr.vmem [resolvable:$true] %s41_s13  ;;  %s25_s16 = int_to_ptr.hbm [resolvable:$true] %s24_s16 }
   0x5   :  { %s1798_s17 = smov 256   ;;  %s1799_s18 = smov 16  }
   0x6   :  { %47 = dma.hbm_to_vmem [thread:$0]  %s40_s11, 4096, %s42_s13, [#allocation6], %s1798_s17, %s1798_s17, %s1799_s18  }
   0x7   :  { %s1800_s19 = smov [#allocation2]   ;;  %s53_s23 = sshll.u32 %s1941_s4, 4  ;;  %s54_s23 = int_to_ptr.hbm [resolvable:$true] %s53_s23 }
   0x8   :  { %s26_s20 = sshll.u32 %s1800_s19, 4  ;;  %s67_s25 = sshll.u32 %s1944_s7, 4  ;;  %s27_s20 = int_to_ptr.vmem [resolvable:$true] %s26_s20  ;;  %s68_s25 = int_to_ptr.hbm [resolvable:$true] %s67_s25 }
   0x9   :  { %32 = dma.hbm_to_vmem [thread:$0]  %s25_s16, 8192, %s27_s20, [#allocation3], %s1798_s17, %s1798_s17, %s1799_s18  }
   0xa   :  { %s1801_s26 = smov [#allocation7]   ;;  %s1802_s1 = smov [#allocation8]  }
   0xb   :  { %s55_s27 = sshll.u32 %s1801_s26, 4  ;;  %s69_s28 = sshll.u32 %s1802_s1, 4  ;;  %s56_s27 = int_to_ptr.vmem [resolvable:$true] %s55_s27  ;;  %s70_s28 = int_to_ptr.vmem [resolvable:$true] %s69_s28 }
   0xc   :  { %58 = dma.hbm_to_vmem [thread:$0]  %s54_s23, 64, %s56_s27, [#allocation6]  }
   0xd   :  { %s1803_s29 = smov 64   ;;  %s1804_s30 = smov 4  }
   0xe   :  { %75 = dma.hbm_to_vmem [thread:$0]  %s68_s25, 1024, %s70_s28, [#allocation9], %s1803_s29, %s1803_s29, %s1804_s30  }
   0xf   :  { %1789 = dma.done.wait [#allocation3], 8192  }
  0x10   :  { %1790 = vsyncadd [#allocation3], 4294959104 }
  0x11   :  { %1791 = dma.done.wait [#allocation6], 4160  }
  0x12   :  { %1792 = vsyncadd [#allocation6], 4294963136 }
  0x13   :  { %1793 = dma.done.wait [#allocation9], 1024  }
  0x14   :  { %1794 = vsyncadd [#allocation9], 4294966272  ;;  %v1194_v0 = vld [vmem:[#allocation2 + $0xe0] sm:$0xf]  ;;  %v1558_v1 = vld [vmem:[#allocation2 + $0xec] sm:$0xf0] }
  0x15   :  { %v1322_v2 = vld [vmem:[#allocation2 + $0x1e0] sm:$0xf]  ;;  %v1195_v3 = vor.u32 %v1558_v1, %v1194_v0  ;;  %v1590_v4 = vld [vmem:[#allocation2 + $0x1ec] sm:$0xf0]  ;;  %v1556_v5 = vld [vmem:[#allocation2 + $0xe4] sm:$0xf] }
  0x16   :  { %v1196_v6 = vld [vmem:[#allocation2 + $0xf0] sm:$0xf0]  ;;  %v1323_v7 = vor.u32 %v1590_v4, %v1322_v2  ;;  %v1588_v9 = vld [vmem:[#allocation2 + $0x1e4] sm:$0xf]  ;;  %v1178_v11 = vld [vmem:[#allocation2 + $0xc0] sm:$0xf] }
  0x17   :  { %v1199_v8 = vor.u32 %v1556_v5, %v1196_v6  ;;  %v1324_v10 = vld [vmem:[#allocation2 + $0x1f0] sm:$0xf0]  ;;  %495 = vmatpush.bf16.msra.mxu0 %v1195_v3  ;;  %v1554_v13 = vld [vmem:[#allocation2 + $0xcc] sm:$0xf0]  ;;  %v1306_v14 = vld [vmem:[#allocation2 + $0x1c0] sm:$0xf] }
  0x18   :  { %v1327_v12 = vor.u32 %v1588_v9, %v1324_v10  ;;  %v1586_v15 = vld [vmem:[#allocation2 + $0x1cc] sm:$0xf0]  ;;  %508 = vmatpush.bf16.msra.mxu1 %v1323_v7  ;;  %v1179_v16 = vor.u32 %v1554_v13, %v1178_v11  ;;  %v1552_v18 = vld [vmem:[#allocation2 + $0xc4] sm:$0xf]  ;;  %v1180_v19 = vld [vmem:[#allocation2 + $0xd0] sm:$0xf0] }
  0x19   :  { %521 = vmatpush.bf16.msra.mxu2 %v1199_v8  ;;  %v1307_v17 = vor.u32 %v1586_v15, %v1306_v14  ;;  %v1584_v20 = vld [vmem:[#allocation2 + $0x1c4] sm:$0xf]  ;;  %v1183_v21 = vor.u32 %v1552_v18, %v1180_v19  ;;  %v1308_v22 = vld [vmem:[#allocation2 + $0x1d0] sm:$0xf0]  ;;  %v1162_v23 = vld [vmem:[#allocation2 + $0xa0] sm:$0xf] }
  0x1a   :  { %534 = vmatpush.bf16.msra.mxu3 %v1327_v12  ;;  %v1550_v24 = vld [vmem:[#allocation2 + $0xac] sm:$0xf0]  ;;  %v1311_v25 = vor.u32 %v1584_v20, %v1308_v22  ;;  %v1290_v26 = vld [vmem:[#allocation2 + $0x1a0] sm:$0xf]  ;;  %v1548_v28 = vld [vmem:[#allocation2 + $0xa4] sm:$0xf] }
  0x1b   :  { %v1582_v27 = vld [vmem:[#allocation2 + $0x1ac] sm:$0xf0]  ;;  %496 = vmatpush.bf16.msra.mxu0 %v1179_v16  ;;  %v1163_v29 = vor.u32 %v1550_v24, %v1162_v23  ;;  %v1164_v30 = vld [vmem:[#allocation2 + $0xb0] sm:$0xf0]  ;;  %v1580_v31 = vld [vmem:[#allocation2 + $0x1a4] sm:$0xf] }
  0x1c   :  { %v1292_v32 = vld [vmem:[#allocation2 + $0x1b0] sm:$0xf0]  ;;  %509 = vmatpush.bf16.msra.mxu1 %v1307_v17  ;;  %v1291_v33 = vor.u32 %v1582_v27, %v1290_v26  ;;  %v1167_v34 = vor.u32 %v1548_v28, %v1164_v30  ;;  %v1146_v35 = vld [vmem:[#allocation2 + $0x80] sm:$0xf]  ;;  %v1546_v36 = vld [vmem:[#allocation2 + $0x8c] sm:$0xf0] }
  0x1d   :  { %522 = vmatpush.bf16.msra.mxu2 %v1183_v21  ;;  %v1274_v37 = vld [vmem:[#allocation2 + $0x180] sm:$0xf]  ;;  %v1295_v38 = vor.u32 %v1580_v31, %v1292_v32  ;;  %v1578_v39 = vld [vmem:[#allocation2 + $0x18c] sm:$0xf0]  ;;  %v1544_v40 = vld [vmem:[#allocation2 + $0x84] sm:$0xf]  ;;  %v1147_v44 = vor.u32 %v1546_v36, %v1146_v35 }
  0x1e   :  { %535 = vmatpush.bf16.msra.mxu3 %v1311_v25  ;;  %v1148_v41 = vld [vmem:[#allocation2 + $0x90] sm:$0xf0]  ;;  %v1576_v42 = vld [vmem:[#allocation2 + $0x184] sm:$0xf]  ;;  %v1275_v45 = vor.u32 %v1578_v39, %v1274_v37  ;;  %v1130_v47 = vld [vmem:[#allocation2 + $0x60] sm:$0xf] }
  0x1f   :  { %v1276_v43 = vld [vmem:[#allocation2 + $0x190] sm:$0xf0]  ;;  %497 = vmatpush.bf16.msra.mxu0 %v1163_v29  ;;  %v1151_v46 = vor.u32 %v1544_v40, %v1148_v41  ;;  %v1542_v48 = vld [vmem:[#allocation2 + $0x6c] sm:$0xf0]  ;;  %v1258_v49 = vld [vmem:[#allocation2 + $0x160] sm:$0xf] }
  0x20   :  { %510 = vmatpush.bf16.msra.mxu1 %v1291_v33  ;;  %v1279_v50 = vor.u32 %v1576_v42, %v1276_v43  ;;  %v1574_v51 = vld [vmem:[#allocation2 + $0x16c] sm:$0xf0]  ;;  %v1540_v52 = vld [vmem:[#allocation2 + $0x64] sm:$0xf]  ;;  %v1132_v53 = vld [vmem:[#allocation2 + $0x70] sm:$0xf0]  ;;  %v1131_v56 = vor.u32 %v1542_v48, %v1130_v47 }
  0x21   :  { %523 = vmatpush.bf16.msra.mxu2 %v1167_v34  ;;  %v1572_v54 = vld [vmem:[#allocation2 + $0x164] sm:$0xf]  ;;  %v1260_v55 = vld [vmem:[#allocation2 + $0x170] sm:$0xf0]  ;;  %v1259_v57 = vor.u32 %v1574_v51, %v1258_v49  ;;  %v1135_v58 = vor.u32 %v1540_v52, %v1132_v53  ;;  %v1114_v59 = vld [vmem:[#allocation2 + $0x40] sm:$0xf] }
  0x22   :  { %536 = vmatpush.bf16.msra.mxu3 %v1295_v38  ;;  %v1538_v60 = vld [vmem:[#allocation2 + $0x4c] sm:$0xf0]  ;;  %v1242_v61 = vld [vmem:[#allocation2 + $0x140] sm:$0xf]  ;;  %v1263_v62 = vor.u32 %v1572_v54, %v1260_v55  ;;  %v1536_v0 = vld [vmem:[#allocation2 + $0x44] sm:$0xf] }
  0x23   :  { %498 = vmatpush.bf16.msra.mxu0 %v1147_v44  ;;  %v1570_v63 = vld [vmem:[#allocation2 + $0x14c] sm:$0xf0]  ;;  %v1116_v1 = vld [vmem:[#allocation2 + $0x50] sm:$0xf0]  ;;  %v1568_v2 = vld [vmem:[#allocation2 + $0x144] sm:$0xf]  ;;  %v1115_v4 = vor.u32 %v1538_v60, %v1114_v59 }
  0x24   :  { %511 = vmatpush.bf16.msra.mxu1 %v1275_v45  ;;  %v1244_v3 = vld [vmem:[#allocation2 + $0x150] sm:$0xf0]  ;;  %v1243_v5 = vor.u32 %v1570_v63, %v1242_v61  ;;  %v1119_v6 = vor.u32 %v1536_v0, %v1116_v1  ;;  %v1098_v7 = vld [vmem:[#allocation2 + $0x20] sm:$0xf]  ;;  %v1534_v8 = vld [vmem:[#allocation2 + $0x2c] sm:$0xf0] }
  0x25   :  { %524 = vmatpush.bf16.msra.mxu2 %v1151_v46  ;;  %v1226_v9 = vld [vmem:[#allocation2 + $0x120] sm:$0xf]  ;;  %v1247_v10 = vor.u32 %v1568_v2, %v1244_v3  ;;  %v1566_v11 = vld [vmem:[#allocation2 + $0x12c] sm:$0xf0]  ;;  %v1532_v12 = vld [vmem:[#allocation2 + $0x24] sm:$0xf]  ;;  %v1099_v17 = vor.u32 %v1534_v8, %v1098_v7 }
  0x26   :  { %537 = vmatpush.bf16.msra.mxu3 %v1279_v50  ;;  %v1100_v13 = vld [vmem:[#allocation2 + $0x30] sm:$0xf0]  ;;  %v1564_v14 = vld [vmem:[#allocation2 + $0x124] sm:$0xf]  ;;  %v1082_v16 = vld [vmem:[#allocation2] sm:$0xf]  ;;  %v1227_v21 = vor.u32 %v1566_v11, %v1226_v9 }
  0x27   :  { %499 = vmatpush.bf16.msra.mxu0 %v1131_v56  ;;  %v1228_v15 = vld [vmem:[#allocation2 + $0x130] sm:$0xf0]  ;;  %v1530_v18 = vld [vmem:[#allocation2 + $0xc] sm:$0xf0]  ;;  %v1210_v19 = vld [vmem:[#allocation2 + $0x100] sm:$0xf]  ;;  %v1103_v22 = vor.u32 %v1532_v12, %v1100_v13 }
  0x28   :  { %512 = vmatpush.bf16.msra.mxu1 %v1259_v57  ;;  %v1562_v20 = vld [vmem:[#allocation2 + $0x10c] sm:$0xf0]  ;;  %v1528_v23 = vld [vmem:[#allocation2 + $0x4] sm:$0xf]  ;;  %v1084_v24 = vld [vmem:[#allocation2 + $0x10] sm:$0xf0]  ;;  %v1231_v26 = vor.u32 %v1564_v14, %v1228_v15  ;;  %v1083_v33 = vor.u32 %v1530_v18, %v1082_v16 }
  0x29   :  { %525 = vmatpush.bf16.msra.mxu2 %v1135_v58  ;;  %v1560_v25 = vld [vmem:[#allocation2 + $0x104] sm:$0xf]  ;;  %v1212_v27 = vld [vmem:[#allocation2 + $0x110] sm:$0xf0]  ;;  %v1202_v28 = vld [vmem:[#allocation2 + $0xe8] sm:$0xf]  ;;  %v1211_v36 = vor.u32 %v1562_v20, %v1210_v19  ;;  %v1087_v37 = vor.u32 %v1528_v23, %v1084_v24 }
  0x2a   :  { %538 = vmatpush.bf16.msra.mxu3 %v1263_v62  ;;  %v1559_v29 = vld [vmem:[#allocation2 + $0xf4] sm:$0xf0]  ;;  %v1330_v30 = vld [vmem:[#allocation2 + $0x1e8] sm:$0xf]  ;;  %v1557_v34 = vld [vmem:[#allocation2 + $0xec] sm:$0xf]  ;;  %v1215_v40 = vor.u32 %v1560_v25, %v1212_v27 }
  0x2b   :  { %500 = vmatpush.bf16.msra.mxu0 %v1115_v4  ;;  %v1591_v31 = vld [vmem:[#allocation2 + $0x1f4] sm:$0xf0]  ;;  %v1204_v35 = vld [vmem:[#allocation2 + $0xf8] sm:$0xf0]  ;;  %v1589_v38 = vld [vmem:[#allocation2 + $0x1ec] sm:$0xf]  ;;  %v1203_v41 = vor.u32 %v1559_v29, %v1202_v28 }
  0x2c   :  { %513 = vmatpush.bf16.msra.mxu1 %v1243_v5  ;;  %v94_v32 = vld [vmem:[%s1937_s0] sm:$0x3]  ;;  %v1332_v39 = vld [vmem:[#allocation2 + $0x1f8] sm:$0xf0]  ;;  %v1331_v42 = vor.u32 %v1591_v31, %v1330_v30  ;;  %v1207_v43 = vor.u32 %v1557_v34, %v1204_v35  ;;  %v1186_v44 = vld [vmem:[#allocation2 + $0xc8] sm:$0xf] }
  0x2d   :  { %526 = vmatpush.bf16.msra.mxu2 %v1119_v6  ;;  %170 = vst [vmem:[#allocation1] ss:$9 sm:$0xff] %v94_v32  ;;  %v1555_v45 = vld [vmem:[#allocation2 + $0xd4] sm:$0xf0]  ;;  %v1314_v46 = vld [vmem:[#allocation2 + $0x1c8] sm:$0xf]  ;;  %v1335_v47 = vor.u32 %v1589_v38, %v1332_v39 }
  0x2e   :  { %539 = vmatpush.bf16.msra.mxu3 %v1247_v10  ;;  %v1587_v48 = vld [vmem:[#allocation2 + $0x1d4] sm:$0xf0]  ;;  %v1553_v49 = vld [vmem:[#allocation2 + $0xcc] sm:$0xf]  ;;  %v1188_v50 = vld [vmem:[#allocation2 + $0xd8] sm:$0xf0]  ;;  %v1187_v53 = vor.u32 %v1555_v45, %v1186_v44 }
  0x2f   :  { %501 = vmatpush.bf16.msra.mxu0 %v1099_v17  ;;  %v1585_v51 = vld [vmem:[#allocation2 + $0x1cc] sm:$0xf]  ;;  %v1316_v52 = vld [vmem:[#allocation2 + $0x1d8] sm:$0xf0]  ;;  %v1170_v54 = vld [vmem:[#allocation2 + $0xa8] sm:$0xf]  ;;  %v1315_v56 = vor.u32 %v1587_v48, %v1314_v46  ;;  %v1191_v57 = vor.u32 %v1553_v49, %v1188_v50 }
  0x30   :  { %514 = vmatpush.bf16.msra.mxu1 %v1227_v21  ;;  %v1551_v55 = vld [vmem:[#allocation2 + $0xb4] sm:$0xf0]  ;;  %v1298_v59 = vld [vmem:[#allocation2 + $0x1a8] sm:$0xf]  ;;  %v1319_v61 = vor.u32 %v1585_v51, %v1316_v52  ;;  %v1549_v63 = vld [vmem:[#allocation2 + $0xac] sm:$0xf] }
  0x31   :  { %527 = vmatpush.bf16.msra.mxu2 %v1103_v22  ;;  %v1583_v62 = vld [vmem:[#allocation2 + $0x1b4] sm:$0xf0]  ;;  %v1172_v0 = vld [vmem:[#allocation2 + $0xb8] sm:$0xf0]  ;;  %v1581_v1 = vld [vmem:[#allocation2 + $0x1ac] sm:$0xf]  ;;  %v1171_v3 = vor.u32 %v1551_v55, %v1170_v54 }
  0x32   :  { %540 = vmatpush.bf16.msra.mxu3 %v1231_v26  ;;  %v1300_v2 = vld [vmem:[#allocation2 + $0x1b8] sm:$0xf0]  ;;  %v1299_v4 = vor.u32 %v1583_v62, %v1298_v59  ;;  %v1175_v5 = vor.u32 %v1549_v63, %v1172_v0  ;;  %v1154_v6 = vld [vmem:[#allocation2 + $0x88] sm:$0xf]  ;;  %v1547_v7 = vld [vmem:[#allocation2 + $0x94] sm:$0xf0] }
  0x33   :  { %502 = vmatpush.bf16.msra.mxu0 %v1083_v33  ;;  %v1282_v8 = vld [vmem:[#allocation2 + $0x188] sm:$0xf]  ;;  %v1303_v9 = vor.u32 %v1581_v1, %v1300_v2  ;;  %v1579_v10 = vld [vmem:[#allocation2 + $0x194] sm:$0xf0]  ;;  %v1545_v11 = vld [vmem:[#allocation2 + $0x8c] sm:$0xf]  ;;  %v1155_v15 = vor.u32 %v1547_v7, %v1154_v6 }
  0x34   :  { %515 = vmatpush.bf16.msra.mxu1 %v1211_v36  ;;  %v1871_v58 = vld [vmem:[#allocation1] sm:$0xff]  ;;  %v1873_v60 = vld [vmem:[#allocation1 + $0x9] sm:$0xff]  ;;  %v1577_v13 = vld [vmem:[#allocation2 + $0x18c] sm:$0xf]  ;;  %v1283_v17 = vor.u32 %v1579_v10, %v1282_v8  ;;  %s1805_s1 = smov [#allocation10]  }
  0x35   :  { %528 = vmatpush.bf16.msra.mxu2 %v1087_v37  ;;  %v1156_v12 = vld [vmem:[#allocation2 + $0x98] sm:$0xf0]  ;;  %v1138_v16 = vld [vmem:[#allocation2 + $0x68] sm:$0xf]  ;;  %v1543_v19 = vld [vmem:[#allocation2 + $0x74] sm:$0xf0] }
  0x36   :  { %541 = vmatpush.bf16.msra.mxu3 %v1215_v40  ;;  %503 = vmatmul.bf16.vlgmr.msra.gmra.mxu0 %v1871_v58  ;;  %v1284_v14 = vld [vmem:[#allocation2 + $0x198] sm:$0xf0]  ;;  %v1159_v18 = vor.u32 %v1545_v11, %v1156_v12  ;;  %v1266_v20 = vld [vmem:[#allocation2 + $0x168] sm:$0xf]  ;;  %v1575_v21 = vld [vmem:[#allocation2 + $0x174] sm:$0xf0]  ;;  %v1139_v27 = vor.u32 %v1543_v19, %v1138_v16 }
  0x37   :  { %547 = vmatpush.bf16.msrb.mxu0 %v1203_v41  ;;  %516 = vmatmul.bf16.vlgmr.msra.gmra.mxu1 %v1873_v60  ;;  %v1287_v22 = vor.u32 %v1577_v13, %v1284_v14  ;;  %v1541_v23 = vld [vmem:[#allocation2 + $0x6c] sm:$0xf]  ;;  %v1140_v24 = vld [vmem:[#allocation2 + $0x78] sm:$0xf0]  ;;  %v1267_v28 = vor.u32 %v1575_v21, %v1266_v20  ;;  %v1122_v30 = vld [vmem:[#allocation2 + $0x48] sm:$0xf] }
  0x38   :  { %560 = vmatpush.bf16.msrb.mxu1 %v1331_v42  ;;  %529 = vmatmul.bf16.vlgmr.msra.gmra.mxu2 %v1871_v58  ;;  %v1573_v25 = vld [vmem:[#allocation2 + $0x16c] sm:$0xf]  ;;  %v1268_v26 = vld [vmem:[#allocation2 + $0x178] sm:$0xf0]  ;;  %v1143_v29 = vor.u32 %v1541_v23, %v1140_v24  ;;  %v1539_v31 = vld [vmem:[#allocation2 + $0x54] sm:$0xf0] }
  0x39   :  { %573 = vmatpush.bf16.msrb.mxu2 %v1207_v43  ;;  %542 = vmatmul.bf16.vlgmr.msra.gmra.mxu3 %v1873_v60  ;;  %v1250_v32 = vld [vmem:[#allocation2 + $0x148] sm:$0xf]  ;;  %v1271_v33 = vor.u32 %v1573_v25, %v1268_v26  ;;  %v1571_v34 = vld [vmem:[#allocation2 + $0x154] sm:$0xf0]  ;;  %v1537_v35 = vld [vmem:[#allocation2 + $0x4c] sm:$0xf]  ;;  %v1123_v39 = vor.u32 %v1539_v31, %v1122_v30 }
  0x3a   :  { %586 = vmatpush.bf16.msrb.mxu3 %v1335_v47  ;;  %v1124_v36 = vld [vmem:[#allocation2 + $0x58] sm:$0xf0]  ;;  %v1569_v37 = vld [vmem:[#allocation2 + $0x14c] sm:$0xf]  ;;  %v1251_v40 = vor.u32 %v1571_v34, %v1250_v32  ;;  %v1106_v42 = vld [vmem:[#allocation2 + $0x28] sm:$0xf] }
  0x3b   :  { %548 = vmatpush.bf16.msrb.mxu0 %v1187_v53  ;;  %v1252_v38 = vld [vmem:[#allocation2 + $0x158] sm:$0xf0]  ;;  %v1127_v41 = vor.u32 %v1537_v35, %v1124_v36  ;;  %v1535_v43 = vld [vmem:[#allocation2 + $0x34] sm:$0xf0]  ;;  %v1234_v44 = vld [vmem:[#allocation2 + $0x128] sm:$0xf] }
  0x3c   :  { %561 = vmatpush.bf16.msrb.mxu1 %v1315_v56  ;;  %v1255_v45 = vor.u32 %v1569_v37, %v1252_v38  ;;  %v1567_v46 = vld [vmem:[#allocation2 + $0x134] sm:$0xf0]  ;;  %v1533_v47 = vld [vmem:[#allocation2 + $0x2c] sm:$0xf]  ;;  %v1108_v48 = vld [vmem:[#allocation2 + $0x38] sm:$0xf0]  ;;  %v1107_v51 = vor.u32 %v1535_v43, %v1106_v42 }
  0x3d   :  { %574 = vmatpush.bf16.msrb.mxu2 %v1191_v57  ;;  %v1565_v49 = vld [vmem:[#allocation2 + $0x12c] sm:$0xf]  ;;  %v1236_v50 = vld [vmem:[#allocation2 + $0x138] sm:$0xf0]  ;;  %v1235_v52 = vor.u32 %v1567_v46, %v1234_v44  ;;  %v1111_v53 = vor.u32 %v1533_v47, %v1108_v48  ;;  %v1090_v54 = vld [vmem:[#allocation2 + $0x8] sm:$0xf] }
  0x3e   :  { %587 = vmatpush.bf16.msrb.mxu3 %v1319_v61  ;;  %v1531_v55 = vld [vmem:[#allocation2 + $0x14] sm:$0xf0]  ;;  %v1218_v56 = vld [vmem:[#allocation2 + $0x108] sm:$0xf]  ;;  %v1239_v57 = vor.u32 %v1565_v49, %v1236_v50  ;;  %v1529_v61 = vld [vmem:[#allocation2 + $0xc] sm:$0xf] }
  0x3f   :  { %549 = vmatpush.bf16.msrb.mxu0 %v1171_v3  ;;  %v1563_v59 = vld [vmem:[#allocation2 + $0x114] sm:$0xf0]  ;;  %v1092_v62 = vld [vmem:[#allocation2 + $0x18] sm:$0xf0]  ;;  %v1561_v63 = vld [vmem:[#allocation2 + $0x10c] sm:$0xf]  ;;  %v1091_v1 = vor.u32 %v1531_v55, %v1090_v54 }
  0x40   :  { %562 = vmatpush.bf16.msrb.mxu1 %v1299_v4  ;;  %v1220_v0 = vld [vmem:[#allocation2 + $0x118] sm:$0xf0]  ;;  %v1219_v2 = vor.u32 %v1563_v59, %v1218_v56  ;;  %v1095_v3 = vor.u32 %v1529_v61, %v1092_v62  ;;  %v1622_v6 = vld [vmem:[#allocation5 + $0xec] sm:$0xf0]  ;;  %v1620_v7 = vld [vmem:[#allocation5 + $0xe4] sm:$0xf] }
  0x41   :  { %575 = vmatpush.bf16.msrb.mxu2 %v1175_v5  ;;  %v1223_v4 = vor.u32 %v1561_v63, %v1220_v0  ;;  %v1450_v5 = vld [vmem:[#allocation5 + $0xe0] sm:$0xf]  ;;  %v1458_v10 = vld [vmem:[#allocation5 + $0xe8] sm:$0xf]  ;;  %v1623_v11 = vld [vmem:[#allocation5 + $0xf4] sm:$0xf0] }
  0x42   :  { %588 = vmatpush.bf16.msrb.mxu3 %v1303_v9  ;;  %v1451_v8 = vor.u32 %v1622_v6, %v1450_v5  ;;  %v1452_v9 = vld [vmem:[#allocation5 + $0xf0] sm:$0xf0]  ;;  %v1459_v13 = vor.u32 %v1623_v11, %v1458_v10  ;;  %v1621_v14 = vld [vmem:[#allocation5 + $0xec] sm:$0xf]  ;;  %v1442_v20 = vld [vmem:[#allocation5 + $0xc8] sm:$0xf] }
  0x43   :  { %550 = vmatpush.bf16.msrb.mxu0 %v1155_v15  ;;  %v1455_v12 = vor.u32 %v1620_v7, %v1452_v9  ;;  %v1460_v15 = vld [vmem:[#allocation5 + $0xf8] sm:$0xf0]  ;;  %v1436_v19 = vld [vmem:[#allocation5 + $0xd0] sm:$0xf0]  ;;  %v1619_v21 = vld [vmem:[#allocation5 + $0xd4] sm:$0xf0] }
  0x44   :  { %563 = vmatpush.bf16.msrb.mxu1 %v1283_v17  ;;  %v1463_v16 = vor.u32 %v1621_v14, %v1460_v15  ;;  %v1434_v17 = vld [vmem:[#allocation5 + $0xc0] sm:$0xf]  ;;  %v1443_v24 = vor.u32 %v1619_v21, %v1442_v20  ;;  %v1617_v25 = vld [vmem:[#allocation5 + $0xcc] sm:$0xf]  ;;  %v1444_v26 = vld [vmem:[#allocation5 + $0xd8] sm:$0xf0] }
  0x45   :  { %576 = vmatpush.bf16.msrb.mxu2 %v1159_v18  ;;  %v1616_v18 = vld [vmem:[#allocation5 + $0xc4] sm:$0xf]  ;;  %v1614_v30 = vld [vmem:[#allocation5 + $0xac] sm:$0xf0]  ;;  %v1426_v34 = vld [vmem:[#allocation5 + $0xa8] sm:$0xf] }
  0x46   :  { %589 = vmatpush.bf16.msrb.mxu3 %v1287_v22  ;;  %v1439_v23 = vor.u32 %v1616_v18, %v1436_v19  ;;  %v1612_v31 = vld [vmem:[#allocation5 + $0xa4] sm:$0xf]  ;;  %v1615_v36 = vld [vmem:[#allocation5 + $0xb4] sm:$0xf0]  ;;  %v1613_v37 = vld [vmem:[#allocation5 + $0xac] sm:$0xf] }
  0x47   :  { %551 = vmatpush.bf16.msrb.mxu0 %v1139_v27  ;;  %v1428_v38 = vld [vmem:[#allocation5 + $0xb8] sm:$0xf0]  ;;  %v1402_v43 = vld [vmem:[#allocation5 + $0x80] sm:$0xf]  ;;  %v1610_v44 = vld [vmem:[#allocation5 + $0x8c] sm:$0xf0] }
  0x48   :  { %564 = vmatpush.bf16.msrb.mxu1 %v1267_v28  ;;  %v1447_v28 = vor.u32 %v1617_v25, %v1444_v26  ;;  %v1403_v46 = vor.u32 %v1610_v44, %v1402_v43  ;;  %v1404_v47 = vld [vmem:[#allocation5 + $0x90] sm:$0xf0]  ;;  %v1410_v48 = vld [vmem:[#allocation5 + $0x88] sm:$0xf]  ;;  %v1611_v49 = vld [vmem:[#allocation5 + $0x94] sm:$0xf0] }
  0x49   :  { %577 = vmatpush.bf16.msrb.mxu2 %v1143_v29  ;;  %v1418_v29 = vld [vmem:[#allocation5 + $0xa0] sm:$0xf]  ;;  %v1412_v54 = vld [vmem:[#allocation5 + $0x98] sm:$0xf0]  ;;  %v1606_v59 = vld [vmem:[#allocation5 + $0x6c] sm:$0xf0] }
  0x4a   :  { %590 = vmatpush.bf16.msrb.mxu3 %v1271_v33  ;;  %v1419_v32 = vor.u32 %v1614_v30, %v1418_v29  ;;  %v1420_v33 = vld [vmem:[#allocation5 + $0xb0] sm:$0xf0]  ;;  %v1604_v62 = vld [vmem:[#allocation5 + $0x64] sm:$0xf]  ;;  %v1394_v0 = vld [vmem:[#allocation5 + $0x68] sm:$0xf] }
  0x4b   :  { %552 = vmatpush.bf16.msrb.mxu0 %v1123_v39  ;;  %v1423_v35 = vor.u32 %v1612_v31, %v1420_v33  ;;  %v1388_v63 = vld [vmem:[#allocation5 + $0x70] sm:$0xf0]  ;;  %v1370_v10 = vld [vmem:[#allocation5 + $0x40] sm:$0xf]  ;;  %v1602_v11 = vld [vmem:[#allocation5 + $0x4c] sm:$0xf0] }
  0x4c   :  { %565 = vmatpush.bf16.msrb.mxu1 %v1251_v40  ;;  %v1427_v40 = vor.u32 %v1615_v36, %v1426_v34  ;;  %v1372_v14 = vld [vmem:[#allocation5 + $0x50] sm:$0xf0]  ;;  %v1378_v15 = vld [vmem:[#allocation5 + $0x48] sm:$0xf]  ;;  %v1380_v19 = vld [vmem:[#allocation5 + $0x58] sm:$0xf0] }
  0x4d   :  { %578 = vmatpush.bf16.msrb.mxu2 %v1127_v41  ;;  %v1431_v41 = vor.u32 %v1613_v37, %v1428_v38  ;;  %v1354_v21 = vld [vmem:[#allocation5 + $0x20] sm:$0xf]  ;;  %v1362_v29 = vld [vmem:[#allocation5 + $0x28] sm:$0xf]  ;;  %v1599_v31 = vld [vmem:[#allocation5 + $0x34] sm:$0xf0] }
  0x4e   :  { %591 = vmatpush.bf16.msrb.mxu3 %v1255_v45  ;;  %v1608_v45 = vld [vmem:[#allocation5 + $0x84] sm:$0xf]  ;;  %v1364_v33 = vld [vmem:[#allocation5 + $0x38] sm:$0xf0]  ;;  %v1363_v34 = vor.u32 %v1599_v31, %v1362_v29  ;;  %v1338_v37 = vld [vmem:[#allocation5] sm:$0xf] }
  0x4f   :  { %553 = vmatpush.bf16.msrb.mxu0 %v1107_v51  ;;  %v1407_v51 = vor.u32 %v1608_v45, %v1404_v47  ;;  %v1594_v38 = vld [vmem:[#allocation5 + $0xc] sm:$0xf0]  ;;  %v1340_v44 = vld [vmem:[#allocation5 + $0x10] sm:$0xf0]  ;;  %v1346_v45 = vld [vmem:[#allocation5 + $0x8] sm:$0xf] }
  0x50   :  { %566 = vmatpush.bf16.msrb.mxu1 %v1235_v52  ;;  %v1411_v52 = vor.u32 %v1611_v49, %v1410_v48  ;;  %v1339_v43 = vor.u32 %v1594_v38, %v1338_v37  ;;  %v1593_v49 = vld [vmem:[#allocation5 + $0xc] sm:$0xf]  ;;  %v1624_v29 = vld [vmem:[%s1942_s5] sm:$0xff]  ;;  %s1066_s28 = sshll.u32 %s1805_s1, 4  ;;  %s1067_s28 = int_to_ptr.vmem [resolvable:$true] %s1066_s28 }
  0x51   :  { %579 = vmatpush.bf16.msrb.mxu2 %v1111_v53  ;;  %v1609_v53 = vld [vmem:[#allocation5 + $0x8c] sm:$0xf] }
  0x52   :  { %592 = vmatpush.bf16.msrb.mxu3 %v1239_v57  ;;  %v1415_v56 = vor.u32 %v1609_v53, %v1412_v54  ;;  %v1386_v57 = vld [vmem:[#allocation5 + $0x60] sm:$0xf]  ;;  %v1631_v54 = vld [vmem:[%s1942_s5 + $0x38] sm:$0xff] }
  0x53   :  { %554 = vmatpush.bf16.msrb.mxu0 %v1091_v1  ;;  %v1387_v61 = vor.u32 %v1606_v59, %v1386_v57  ;;  %v1391_v1 = vor.u32 %v1604_v62, %v1388_v63 }
  0x54   :  { %567 = vmatpush.bf16.msrb.mxu1 %v1219_v2  ;;  %v1607_v2 = vld [vmem:[#allocation5 + $0x74] sm:$0xf0] }
  0x55   :  { %580 = vmatpush.bf16.msrb.mxu2 %v1095_v3  ;;  %v1605_v3 = vld [vmem:[#allocation5 + $0x6c] sm:$0xf]  ;;  %v1395_v6 = vor.u32 %v1607_v2, %v1394_v0 }
  0x56   :  { %593 = vmatpush.bf16.msrb.mxu3 %v1223_v4  ;;  %555 = vmatmul.bf16.vlgmr.msrb.gmra.mxu0 %v1871_v58  ;;  %v1396_v4 = vld [vmem:[#allocation5 + $0x78] sm:$0xf0] }
  0x57   :  { %568 = vmatmul.bf16.vlgmr.msrb.gmra.mxu1 %v1873_v60  ;;  %821 = vmatpush.bf16.msra.mxu0 %v1451_v8  ;;  %v1399_v7 = vor.u32 %v1605_v3, %v1396_v4  ;;  %v1894_v8 = vld [vmem:[%s1939_s2] sm:$0xf] }
  0x58   :  { %581 = vmatmul.bf16.vlgmr.msrb.gmra.mxu2 %v1871_v58  ;;  %834 = vmatpush.bf16.msra.mxu1 %v1455_v12  ;;  %v1618_v58 = vld [vmem:[#allocation5 + $0xcc] sm:$0xf0]  ;;  %v1371_v12 = vor.u32 %v1602_v11, %v1370_v10  ;;  %v161_v18 = vperm.slane %v1894_v8, 0  ;;  %v162_v25 = vperm.slane %v1894_v8, 1  ;;  %v164_v62 = vperm.slane %v1894_v8, 3 }
  0x59   :  { %594 = vmatmul.bf16.vlgmr.msrb.gmra.mxu3 %v1873_v60  ;;  %847 = vmatpush.bf16.msra.mxu2 %v1459_v13  ;;  %v1435_v60 = vor.u32 %v1618_v58, %v1434_v17  ;;  %v1600_v13 = vld [vmem:[#allocation5 + $0x44] sm:$0xf]  ;;  %v1603_v17 = vld [vmem:[#allocation5 + $0x54] sm:$0xf0]  ;;  %v1601_v58 = vld [vmem:[#allocation5 + $0x4c] sm:$0xf] }
  0x5a   :  { %860 = vmatpush.bf16.msra.mxu3 %v1463_v16  ;;  %v1375_v16 = vor.u32 %v1600_v13, %v1372_v14  ;;  %v1383_v20 = vor.u32 %v1601_v58, %v1380_v19 }
  0x5b   :  { %822 = vmatpush.bf16.msra.mxu0 %v1435_v60  ;;  %v1379_v60 = vor.u32 %v1603_v17, %v1378_v15 }
  0x5c   :  { %835 = vmatpush.bf16.msra.mxu1 %v1439_v23  ;;  %v1598_v23 = vld [vmem:[#allocation5 + $0x2c] sm:$0xf0] }
  0x5d   :  { %848 = vmatpush.bf16.msra.mxu2 %v1443_v24  ;;  %v1596_v24 = vld [vmem:[#allocation5 + $0x24] sm:$0xf]  ;;  %v1355_v26 = vor.u32 %v1598_v23, %v1354_v21  ;;  %v1630_v21 = vld [vmem:[%s1942_s5 + $0x30] sm:$0xff] }
  0x5e   :  { %861 = vmatpush.bf16.msra.mxu3 %v1447_v28  ;;  %v1356_v28 = vld [vmem:[#allocation5 + $0x30] sm:$0xf0]  ;;  %v1629_v23 = vld [vmem:[%s1942_s5 + $0x28] sm:$0xff] }
  0x5f   :  { %823 = vmatpush.bf16.msra.mxu0 %v1419_v32  ;;  %v1359_v30 = vor.u32 %v1596_v24, %v1356_v28  ;;  %v1597_v32 = vld [vmem:[#allocation5 + $0x2c] sm:$0xf]  ;;  %v1628_v24 = vld [vmem:[%s1942_s5 + $0x20] sm:$0xff]  ;;  %v1625_v28 = vld [vmem:[%s1942_s5 + $0x8] sm:$0xff] }
  0x60   :  { %836 = vmatpush.bf16.msra.mxu1 %v1423_v35  ;;  %v1367_v35 = vor.u32 %v1597_v32, %v1364_v33  ;;  %v1639_v33 = vld [vmem:[#allocation8 + $0x38] sm:$0xff] }
  0x61   :  { %849 = vmatpush.bf16.msra.mxu2 %v1427_v40  ;;  %v1592_v40 = vld [vmem:[#allocation5 + $0x4] sm:$0xf] }
  0x62   :  { %862 = vmatpush.bf16.msra.mxu3 %v1431_v41  ;;  %v1343_v47 = vor.u32 %v1592_v40, %v1340_v44 }
  0x63   :  { %824 = vmatpush.bf16.msra.mxu0 %v1403_v46  ;;  %v1595_v46 = vld [vmem:[#allocation5 + $0x14] sm:$0xf0] }
  0x64   :  { %837 = vmatpush.bf16.msra.mxu1 %v1407_v51  ;;  %v1347_v48 = vor.u32 %v1595_v46, %v1346_v45  ;;  %v163_v51 = vperm.slane %v1894_v8, 2  ;;  %v1637_v45 = vld [vmem:[#allocation8 + $0x28] sm:$0xff] }
  0x65   :  { %850 = vmatpush.bf16.msra.mxu2 %v1411_v52 }
  0x66   :  { %863 = vmatpush.bf16.msra.mxu3 %v1415_v56 }
  0x67   :  { %825 = vmatpush.bf16.msra.mxu0 %v1387_v61 }
  0x68   :  { %838 = vmatpush.bf16.msra.mxu1 %v1391_v1 }
  0x69   :  { %851 = vmatpush.bf16.msra.mxu2 %v1395_v6 }
  0x6a   :  { %864 = vmatpush.bf16.msra.mxu3 %v1399_v7 }
  0x6b   :  { %826 = vmatpush.bf16.msra.mxu0 %v1371_v12 }
  0x6c   :  { %839 = vmatpush.bf16.msra.mxu1 %v1375_v16 }
  0x6d   :  { %852 = vmatpush.bf16.msra.mxu2 %v1379_v60 }
  0x6e   :  { %865 = vmatpush.bf16.msra.mxu3 %v1383_v20 }
  0x6f   :  { %827 = vmatpush.bf16.msra.mxu0 %v1355_v26  ;;  %v1626_v26 = vld [vmem:[%s1942_s5 + $0x10] sm:$0xff] }
  0x70   :  { %840 = vmatpush.bf16.msra.mxu1 %v1359_v30  ;;  %v651_v30 = vld [vmem:[#allocation7] sm:$0xf] }
  0x71   :  { %853 = vmatpush.bf16.msra.mxu2 %v1363_v34  ;;  %v653_v31 = vperm.slane %v651_v30, 0  ;;  %v654_v32 = vperm.slane %v651_v30, 1  ;;  %v656_v44 = vperm.slane %v651_v30, 3 }
  0x72   :  { %866 = vmatpush.bf16.msra.mxu3 %v1367_v35 }
  0x73   :  { %828 = vmatpush.bf16.msra.mxu0 %v1339_v43  ;;  %v655_v43 = vperm.slane %v651_v30, 2 }
  0x74   :  { %841 = vmatpush.bf16.msra.mxu1 %v1343_v47 }
  0x75   :  { %854 = vmatpush.bf16.msra.mxu2 %v1347_v48 }
  0x77   :  { %961 = vmatpush.bf16.msrb.mxu0 %v1631_v54 }
  0x78   :  { %1047 = vmatpush.bf16.msrb.mxu1 %v1639_v33 }
  0x7b   :  { %962 = vmatpush.bf16.msrb.mxu0 %v1630_v21 }
  0x7f   :  { %963 = vmatpush.bf16.msrb.mxu0 %v1629_v23 }
  0x83   :  { %964 = vmatpush.bf16.msrb.mxu0 %v1628_v24 }
  0xb3   :  { %v1883_v22 = vpop.f32.mrf.mxu0 }
  0xb4   :  { %v1885_v27 = vpop.f32.mrf.mxu1  ;;  %v505_v36 = vadd.f32 %v1883_v22, %v161_v18 }
  0xb6   :  { %v518_v52 = vadd.f32 %v1885_v27, %v505_v36  ;;  %v1638_v36 = vld [vmem:[#allocation8 + $0x30] sm:$0xff] }
  0xb7   :  { %1048 = vmatpush.bf16.msrb.mxu1 %v1638_v36 }
  0xb8   :  { %v599_v57 = vmul.f32 0.5, %v518_v52 }
  0xba   :  { %1651 = vtanh.f32 %v599_v57 }
  0xbb   :  { %v1887_v39 = vpop.f32.mrf.mxu2  ;;  %v506_v50 = vpop.f32.mrf.mxu0  ;;  %1049 = vmatpush.bf16.msrb.mxu1 %v1637_v45 }
  0xbc   :  { %v1889_v42 = vpop.f32.mrf.mxu3  ;;  %v519_v55 = vpop.f32.mrf.mxu1  ;;  %v531_v41 = vadd.f32 %v1887_v39, %v162_v25  ;;  %v1348_v50 = vld [vmem:[#allocation5 + $0x18] sm:$0xf0]  ;;  %v1627_v25 = vld [vmem:[%s1942_s5 + $0x18] sm:$0xff] }
  0xbd   :  { %v1351_v22 = vor.u32 %v1593_v49, %v1348_v50  ;;  %965 = vmatpush.bf16.msrb.mxu0 %v1627_v25 }
  0xbe   :  { %v544_v53 = vadd.f32 %v1889_v42, %v531_v41 }
  0xbf   :  { %867 = vmatpush.bf16.msra.mxu3 %v1351_v22  ;;  %v1636_v22 = vld [vmem:[#allocation8 + $0x20] sm:$0xff] }
  0xc0   :  { %v600_v59 = vmul.f32 0.5, %v544_v53  ;;  %v1652_v4 = vpop.eup %1651  ;;  %1050 = vmatpush.bf16.msrb.mxu1 %v1636_v22 }
  0xc1   :  { %v607_v11 = vmul.f32 0.5, %v1652_v4  ;;  %966 = vmatpush.bf16.msrb.mxu0 %v1626_v26 }
  0xc2   :  { %1653 = vtanh.f32 %v600_v59 }
  0xc3   :  { %v532_v5 = vpop.f32.mrf.mxu2  ;;  %v611_v14 = vadd.f32 0.5, %v607_v11  ;;  %v1632_v11 = vld [vmem:[#allocation8] sm:$0xff] }
  0xc4   :  { %v545_v9 = vpop.f32.mrf.mxu3 }
  0xc5   :  { %967 = vmatpush.bf16.msrb.mxu0 %v1625_v28 }
  0xc8   :  { %v1654_v6 = vpop.eup %1653 }
  0xc9   :  { %v608_v12 = vmul.f32 0.5, %v1654_v6  ;;  %968 = vmatpush.bf16.msrb.mxu0 %v1624_v29 }
  0xcb   :  { %v612_v15 = vadd.f32 0.5, %v608_v12  ;;  %v1649_v12 = vld [vmem:[%s1943_s6] ss:$0 sm:$0xff]  ;;  %s1068_s6 = sshll.u32 %s1946_s9, 4  ;;  %s1069_s6 = int_to_ptr.hbm [resolvable:$true] %s1068_s6 }
  0xcd   :  { %v615_v18 = vmax.f32 %v611_v14, %v612_v15 }
  0xd3   :  { %v556_v39 = vpop.f32.mrf.mxu0 }
  0xd4   :  { %v557_v55 = vadd.f32 %v556_v39, %v163_v51  ;;  %v569_v56 = vpop.f32.mrf.mxu1 }
  0xd6   :  { %v570_v61 = vadd.f32 %v569_v56, %v557_v55 }
  0xd8   :  { %v601_v63 = vmul.f32 0.5, %v570_v61 }
  0xda   :  { %1655 = vtanh.f32 %v601_v63 }
  0xdb   :  { %v582_v27 = vpop.f32.mrf.mxu2  ;;  %v558_v1 = vpop.f32.mrf.mxu0 }
  0xdc   :  { %v583_v42 = vadd.f32 %v582_v27, %v164_v62  ;;  %v595_v0 = vpop.f32.mrf.mxu3  ;;  %v571_v2 = vpop.f32.mrf.mxu1 }
  0xde   :  { %v596_v3 = vadd.f32 %v595_v0, %v583_v42 }
  0xe0   :  { %v602_v5 = vmul.f32 0.5, %v596_v3  ;;  %v1656_v7 = vpop.eup %1655 }
  0xe1   :  { %v609_v8 = vmul.f32 0.5, %v1656_v7  ;;  %v1635_v7 = vld [vmem:[#allocation8 + $0x18] sm:$0xff] }
  0xe2   :  { %1657 = vtanh.f32 %v602_v5  ;;  %1051 = vmatpush.bf16.msrb.mxu1 %v1635_v7 }
  0xe3   :  { %v584_v9 = vpop.f32.mrf.mxu2  ;;  %v613_v16 = vadd.f32 0.5, %v609_v8 }
  0xe4   :  { %v597_v10 = vpop.f32.mrf.mxu3  ;;  %v1634_v9 = vld [vmem:[#allocation8 + $0x10] sm:$0xff] }
  0xe5   :  { %v1633_v10 = vld [vmem:[#allocation8 + $0x8] sm:$0xff] }
  0xe6   :  { %1052 = vmatpush.bf16.msrb.mxu1 %v1634_v9 }
  0xe8   :  { %v1658_v13 = vpop.eup %1657 }
  0xe9   :  { %v610_v17 = vmul.f32 0.5, %v1658_v13 }
  0xea   :  { %1053 = vmatpush.bf16.msrb.mxu1 %v1633_v10 }
  0xeb   :  { %v614_v58 = vadd.f32 0.5, %v610_v17 }
  0xed   :  { %v616_v60 = vmax.f32 %v613_v16, %v614_v58 }
  0xee   :  { %1054 = vmatpush.bf16.msrb.mxu1 %v1632_v11 }
  0xef   :  { %v617_v19 = vmax.f32 %v615_v18, %v616_v60  ;;  %v1650_v60 = vld [vmem:[%s1945_s8] ss:$0 sm:$0xff] }
  0xf1   :  { %v618_v20 = vpack.c.bf16 %v617_v19, %v617_v19 }
  0xf3   :  { %829 = vmatmul.bf16.vlgmr.msra.gmra.mxu0 %v618_v20  ;;  %842 = vmatmul.bf16.vlgmr.msra.gmra.mxu1 %v618_v20 }
  0xf4   :  { %855 = vmatmul.bf16.vlgmr.msra.gmra.mxu2 %v618_v20  ;;  %868 = vmatmul.bf16.vlgmr.msra.gmra.mxu3 %v618_v20 }
 0x170   :  { %v830_v34 = vpop.f32.mrf.mxu0  ;;  %v843_v35 = vpop.f32.mrf.mxu1 }
 0x171   :  { %v831_v37 = vadd.f32 %v830_v34, %v653_v31  ;;  %v844_v38 = vadd.f32 %v843_v35, %v654_v32 }
 0x173   :  { %v873_v40 = vmul.f32 0.5, %v831_v37  ;;  %v874_v41 = vmul.f32 0.5, %v844_v38 }
 0x175   :  { %1659 = vtanh.f32 %v873_v40 }
 0x176   :  { %1661 = vtanh.f32 %v874_v41 }
 0x177   :  { %v856_v46 = vpop.f32.mrf.mxu2  ;;  %v869_v47 = vpop.f32.mrf.mxu3 }
 0x178   :  { %v857_v48 = vadd.f32 %v856_v46, %v655_v43  ;;  %v870_v49 = vadd.f32 %v869_v47, %v656_v44  ;;  %v832_v50 = vpop.f32.mrf.mxu0  ;;  %v845_v51 = vpop.f32.mrf.mxu1 }
 0x17a   :  { %v875_v52 = vmul.f32 0.5, %v857_v48  ;;  %v876_v53 = vmul.f32 0.5, %v870_v49 }
 0x17b   :  { %v1660_v39 = vpop.eup %1659 }
 0x17c   :  { %1663 = vtanh.f32 %v875_v52  ;;  %v1662_v54 = vpop.eup %1661  ;;  %v881_v57 = vmul.f32 0.5, %v1660_v39 }
 0x17d   :  { %1665 = vtanh.f32 %v876_v53  ;;  %v882_v59 = vmul.f32 0.5, %v1662_v54 }
 0x17e   :  { %v885_v27 = vadd.f32 0.5, %v881_v57 }
 0x17f   :  { %v858_v55 = vpop.f32.mrf.mxu2  ;;  %v871_v56 = vpop.f32.mrf.mxu3  ;;  %v886_v42 = vadd.f32 0.5, %v882_v59 }
 0x181   :  { %v889_v3 = vmax.f32 %v885_v27, %v886_v42 }
 0x182   :  { %v1664_v61 = vpop.eup %1663 }
 0x183   :  { %v1666_v62 = vpop.eup %1665  ;;  %v883_v63 = vmul.f32 0.5, %v1664_v61 }
 0x184   :  { %v884_v0 = vmul.f32 0.5, %v1666_v62 }
 0x185   :  { %v887_v1 = vadd.f32 0.5, %v883_v63 }
 0x186   :  { %v888_v2 = vadd.f32 0.5, %v884_v0 }
 0x188   :  { %v890_v4 = vmax.f32 %v887_v1, %v888_v2 }
 0x18a   :  { %v891_v5 = vmax.f32 %v889_v3, %v890_v4 }
 0x18c   :  { %v892_v6 = vpack.c.bf16 %v891_v5, %v891_v5 }
 0x18e   :  { %969 = vmatmul.bf16.vlgmr.msrb.gmra.mxu0 %v892_v6 }
 0x20b   :  { %v970_v8 = vpop.f32.mrf.mxu0 }
 0x20c   :  { %v971_v13 = vadd.f32 %v1649_v12, %v970_v8 }
 0x20e   :  { %v974_v14 = vmul.f32 0.5, %v971_v13 }
 0x210   :  { %1667 = vtanh.f32 %v974_v14 }
 0x213   :  { %v972_v15 = vpop.f32.mrf.mxu0 }
 0x216   :  { %v1668_v16 = vpop.eup %1667 }
 0x217   :  { %v976_v17 = vmul.f32 0.5, %v1668_v16 }
 0x219   :  { %v977_v58 = vadd.f32 0.5, %v976_v17 }
 0x21b   :  { %v978_v18 = vpack.c.bf16 %v977_v58, %v977_v58 }
 0x21d   :  { %1055 = vmatmul.bf16.vlgmr.msrb.gmra.mxu1 %v978_v18 }
 0x29a   :  { %v1056_v19 = vpop.f32.mrf.mxu1 }
 0x29b   :  { %v1057_v20 = vadd.f32 %v1650_v60, %v1056_v19 }
 0x29d   :  { %1060 = vst [vmem:[#allocation10] sm:$0x3] %v1057_v20 }
 0x29e   :  { %1071 = dma.vmem_to_hbm [thread:$0]  %s1067_s28, 32, %s1069_s6, [#allocation4]  }
 0x2a2   :  { %v1058_v21 = vpop.f32.mrf.mxu1 }
 0x2a3   :  { %1795 = dma.done.wait [#allocation4], 32  }
 0x2a4   :  { %1796 = vsyncadd [#allocation4], 4294967264 }
 0x2a5   :  { %1076 = vsyncpa [#allocation3], 1 }
 0x2a6   :  { %1077 = vsyncpa [#allocation6], 1 }
 0x2a7   :  { %1078 = vsyncpa [#allocation9], 1 }
 0x2a8   :  { %1079 = vsyncpa [#allocation4], 1 }

</bundles_post_ra>
